<compile_context>
chip_gen: v7x
topology: tpu7x:2x2x1
jax: 0.10.0
libtpu: 0.0.40
codegen_flags: <defaults>
</compile_context>

<pallas_src>
import jax
import jax.numpy as jnp
from jax.experimental import pallas as pl
from jax.experimental.pallas import tpu as pltpu

_LANES = 128


def _linear_clamp_kernel(w_ref, b_ref, xt_ref, o_ref):
    """y = clamp(w . x + b, 0, 1) in the transposed (lane-dense) formulation.

    w_ref : (IN,)     SMEM -- Linear weight row as scalars
    b_ref : (1,)      SMEM -- Linear bias scalar
    xt_ref: (IN, TB)  VMEM -- x^T tile, batch on the lane axis
    o_ref : (1, TB)   VMEM -- output tile, lane-dense
    """
    n_in = xt_ref.shape[0]
    # Bias-initialized accumulator, (1, TB) f32.
    acc = jnp.full(o_ref.shape, b_ref[0], dtype=jnp.float32)
    # Fully unrolled multiply-accumulate over the 16 input features:
    # SMEM scalar weight x lane-dense batch strip.  No MXU, no cross-lane
    # reduce, no (1,16) weight broadcast.
    for k in range(n_in):
        acc = acc + w_ref[k] * xt_ref[pl.ds(k, 1), :]
    # clamp_min(., 0) then clamp_max(., 1)  (matches torch.clamp_min/_max)
    y = jnp.minimum(jnp.maximum(acc, 0.0), 1.0)
    o_ref[...] = y.astype(o_ref.dtype)


def linear_clamp(x, weight, bias, *, tile_b=None):
    """clamp(Linear(IN, 1)(x), 0, 1).

    x: (B, IN) f32, weight: (1, IN) f32 (PyTorch layout), bias: (1,) f32.
    Returns (B, 1) f32.
    """
    B, IN = x.shape
    OUT = weight.shape[0]
    assert OUT == 1 and weight.shape[1] == IN, "kernel specializes Linear(IN, 1)"

    # --- wrapper-side layout plumbing (cheap XLA ops, outside the kernel) ---
    # Batch lives on the lane axis -> pad to a multiple of 128 lanes and of
    # the chosen tile so every block is full and unmasked.
    b_pad = -(-B // _LANES) * _LANES
    if tile_b is None:
        # ~2 MiB f32 per x^T block (16 x 32768 x 4B); with 2x double buffering
        # plus the (1, TB) output this fits v7x's 32 MiB scoped VMEM default.
        tile_b = min(b_pad, 32768)
    tile_b = max(_LANES, (tile_b // _LANES) * _LANES)
    b_pad = -(-b_pad // tile_b) * tile_b

    xt = jnp.zeros((IN, b_pad), x.dtype).at[:, :B].set(x.T)  # (IN, Bp)
    w_flat = weight.reshape(IN)    # (IN,) scalars -> SMEM
    b_flat = bias.reshape(1)       # (1,)  scalar  -> SMEM

    out = pl.pallas_call(
        _linear_clamp_kernel,
        out_shape=jax.ShapeDtypeStruct((1, b_pad), x.dtype),
        grid=(b_pad // tile_b,),
        in_specs=[
            pl.BlockSpec(memory_space=pltpu.MemorySpace.SMEM),   # weight scalars
            pl.BlockSpec(memory_space=pltpu.MemorySpace.SMEM),   # bias scalar
            pl.BlockSpec((IN, tile_b), lambda i: (0, i)),        # x^T tile
        ],
        out_specs=pl.BlockSpec((1, tile_b), lambda i: (0, i)),   # lane-dense out
        compiler_params=pltpu.CompilerParams(
            dimension_semantics=("parallel",)),                  # v7x: use both TCs
    )(w_flat, b_flat, xt)

    # Back to the module's (B, 1) output layout; drop batch padding.
    return out[:, :B].T


if __name__ == "__main__":
    key = jax.random.PRNGKey(0)
    kx, kw, kb = jax.random.split(key, 3)

    B, IN, OUT = 1, 16, 1   # matches torch.randn(1, 16) / Linear(16, 1)

    # Input (matches torch.randn(1, 16))
    x = jax.random.normal(kx, (B, IN), dtype=jnp.float32)

    # Deterministic Linear(16, 1) params, PyTorch-style uniform(-1/sqrt(IN), 1/sqrt(IN))
    bound = 1.0 / (IN ** 0.5)
    weight = jax.random.uniform(kw, (OUT, IN), dtype=jnp.float32,
                                minval=-bound, maxval=bound)
    bias = jax.random.uniform(kb, (OUT,), dtype=jnp.float32,
                              minval=-bound, maxval=bound)

    out = jax.block_until_ready(linear_clamp(x, weight, bias))
    ref = jnp.clip(x @ weight.T + bias, 0.0, 1.0)
    assert out.shape == (B, OUT)
    assert jnp.allclose(out, ref, atol=1e-5, rtol=1e-5)

    # Second check: batched, non-multiple-of-tile batch exercising the
    # padding and multi-step (grid > 1) pipelined path.
    B2 = 300
    x2 = jax.random.normal(kx, (B2, IN), dtype=jnp.float32)
    out2 = jax.block_until_ready(linear_clamp(x2, weight, bias, tile_b=128))
    ref2 = jnp.clip(x2 @ weight.T + bias, 0.0, 1.0)
    assert out2.shape == (B2, OUT)
    assert jnp.allclose(out2, ref2, atol=1e-5, rtol=1e-5)

    print("KERNEL_OK")
</pallas_src>

<mosaic_0001>
module attributes {stable_mosaic.version = 11 : i64} {
  func.func @_linear_clamp_kernel(%arg0: i32, %arg1: memref<16xf32, #tpu.memory_space<smem>>, %arg2: memref<1xf32, #tpu.memory_space<smem>>, %arg3: memref<16x128xf32, #tpu.memory_space<vmem>>, %arg4: memref<1x128xf32, #tpu.memory_space<vmem>>) attributes {dimension_semantics = [#tpu.dimension_semantics<parallel>], iteration_bounds = array<i64: 1>, scalar_prefetch = 0 : i64, scratch_operands = 0 : i64, tpu.core_type = #tpu.core_type<tc>, window_params = [{transform_indices = @transform_0, window_bounds = array<i64: 16>}, {transform_indices = @transform_1, window_bounds = array<i64: 1>}, {transform_indices = @transform_2, window_bounds = array<i64: 16, 128>}, {transform_indices = @transform_3, window_bounds = array<i64: 1, 128>}]} {
    %c0 = arith.constant 0 : index
    %0 = memref.load %arg2[%c0] : memref<1xf32, #tpu.memory_space<smem>>
    %1 = vector.broadcast %0 : f32 to vector<1x128xf32>
    %c0_0 = arith.constant 0 : index
    %2 = memref.load %arg1[%c0_0] : memref<16xf32, #tpu.memory_space<smem>>
    %c0_1 = arith.constant 0 : index
    %c0_2 = arith.constant 0 : index
    %3 = vector.load %arg3[%c0_1, %c0_2] : memref<16x128xf32, #tpu.memory_space<vmem>>, vector<1x128xf32>
    %4 = vector.broadcast %2 : f32 to vector<1x128xf32>
    %5 = arith.mulf %4, %3 : vector<1x128xf32>
    %6 = arith.addf %1, %5 : vector<1x128xf32>
    %c1 = arith.constant 1 : index
    %7 = memref.load %arg1[%c1] : memref<16xf32, #tpu.memory_space<smem>>
    %c1_3 = arith.constant 1 : index
    %c0_4 = arith.constant 0 : index
    %8 = vector.load %arg3[%c1_3, %c0_4] : memref<16x128xf32, #tpu.memory_space<vmem>>, vector<1x128xf32>
    %9 = vector.broadcast %7 : f32 to vector<1x128xf32>
    %10 = arith.mulf %9, %8 : vector<1x128xf32>
    %11 = arith.addf %6, %10 : vector<1x128xf32>
    %c2 = arith.constant 2 : index
    %12 = memref.load %arg1[%c2] : memref<16xf32, #tpu.memory_space<smem>>
    %c2_5 = arith.constant 2 : index
    %c0_6 = arith.constant 0 : index
    %13 = vector.load %arg3[%c2_5, %c0_6] : memref<16x128xf32, #tpu.memory_space<vmem>>, vector<1x128xf32>
    %14 = vector.broadcast %12 : f32 to vector<1x128xf32>
    %15 = arith.mulf %14, %13 : vector<1x128xf32>
    %16 = arith.addf %11, %15 : vector<1x128xf32>
    %c3 = arith.constant 3 : index
    %17 = memref.load %arg1[%c3] : memref<16xf32, #tpu.memory_space<smem>>
    %c3_7 = arith.constant 3 : index
    %c0_8 = arith.constant 0 : index
    %18 = vector.load %arg3[%c3_7, %c0_8] : memref<16x128xf32, #tpu.memory_space<vmem>>, vector<1x128xf32>
    %19 = vector.broadcast %17 : f32 to vector<1x128xf32>
    %20 = arith.mulf %19, %18 : vector<1x128xf32>
    %21 = arith.addf %16, %20 : vector<1x128xf32>
    %c4 = arith.constant 4 : index
    %22 = memref.load %arg1[%c4] : memref<16xf32, #tpu.memory_space<smem>>
    %c4_9 = arith.constant 4 : index
    %c0_10 = arith.constant 0 : index
    %23 = vector.load %arg3[%c4_9, %c0_10] : memref<16x128xf32, #tpu.memory_space<vmem>>, vector<1x128xf32>
    %24 = vector.broadcast %22 : f32 to vector<1x128xf32>
    %25 = arith.mulf %24, %23 : vector<1x128xf32>
    %26 = arith.addf %21, %25 : vector<1x128xf32>
    %c5 = arith.constant 5 : index
    %27 = memref.load %arg1[%c5] : memref<16xf32, #tpu.memory_space<smem>>
    %c5_11 = arith.constant 5 : index
    %c0_12 = arith.constant 0 : index
    %28 = vector.load %arg3[%c5_11, %c0_12] : memref<16x128xf32, #tpu.memory_space<vmem>>, vector<1x128xf32>
    %29 = vector.broadcast %27 : f32 to vector<1x128xf32>
    %30 = arith.mulf %29, %28 : vector<1x128xf32>
    %31 = arith.addf %26, %30 : vector<1x128xf32>
    %c6 = arith.constant 6 : index
    %32 = memref.load %arg1[%c6] : memref<16xf32, #tpu.memory_space<smem>>
    %c6_13 = arith.constant 6 : index
    %c0_14 = arith.constant 0 : index
    %33 = vector.load %arg3[%c6_13, %c0_14] : memref<16x128xf32, #tpu.memory_space<vmem>>, vector<1x128xf32>
    %34 = vector.broadcast %32 : f32 to vector<1x128xf32>
    %35 = arith.mulf %34, %33 : vector<1x128xf32>
    %36 = arith.addf %31, %35 : vector<1x128xf32>
    %c7 = arith.constant 7 : index
    %37 = memref.load %arg1[%c7] : memref<16xf32, #tpu.memory_space<smem>>
    %c7_15 = arith.constant 7 : index
    %c0_16 = arith.constant 0 : index
    %38 = vector.load %arg3[%c7_15, %c0_16] : memref<16x128xf32, #tpu.memory_space<vmem>>, vector<1x128xf32>
    %39 = vector.broadcast %37 : f32 to vector<1x128xf32>
    %40 = arith.mulf %39, %38 : vector<1x128xf32>
    %41 = arith.addf %36, %40 : vector<1x128xf32>
    %c8 = arith.constant 8 : index
    %42 = memref.load %arg1[%c8] : memref<16xf32, #tpu.memory_space<smem>>
    %c8_17 = arith.constant 8 : index
    %c0_18 = arith.constant 0 : index
    %43 = vector.load %arg3[%c8_17, %c0_18] : memref<16x128xf32, #tpu.memory_space<vmem>>, vector<1x128xf32>
    %44 = vector.broadcast %42 : f32 to vector<1x128xf32>
    %45 = arith.mulf %44, %43 : vector<1x128xf32>
    %46 = arith.addf %41, %45 : vector<1x128xf32>
    %c9 = arith.constant 9 : index
    %47 = memref.load %arg1[%c9] : memref<16xf32, #tpu.memory_space<smem>>
    %c9_19 = arith.constant 9 : index
    %c0_20 = arith.constant 0 : index
    %48 = vector.load %arg3[%c9_19, %c0_20] : memref<16x128xf32, #tpu.memory_space<vmem>>, vector<1x128xf32>
    %49 = vector.broadcast %47 : f32 to vector<1x128xf32>
    %50 = arith.mulf %49, %48 : vector<1x128xf32>
    %51 = arith.addf %46, %50 : vector<1x128xf32>
    %c10 = arith.constant 10 : index
    %52 = memref.load %arg1[%c10] : memref<16xf32, #tpu.memory_space<smem>>
    %c10_21 = arith.constant 10 : index
    %c0_22 = arith.constant 0 : index
    %53 = vector.load %arg3[%c10_21, %c0_22] : memref<16x128xf32, #tpu.memory_space<vmem>>, vector<1x128xf32>
    %54 = vector.broadcast %52 : f32 to vector<1x128xf32>
    %55 = arith.mulf %54, %53 : vector<1x128xf32>
    %56 = arith.addf %51, %55 : vector<1x128xf32>
    %c11 = arith.constant 11 : index
    %57 = memref.load %arg1[%c11] : memref<16xf32, #tpu.memory_space<smem>>
    %c11_23 = arith.constant 11 : index
    %c0_24 = arith.constant 0 : index
    %58 = vector.load %arg3[%c11_23, %c0_24] : memref<16x128xf32, #tpu.memory_space<vmem>>, vector<1x128xf32>
    %59 = vector.broadcast %57 : f32 to vector<1x128xf32>
    %60 = arith.mulf %59, %58 : vector<1x128xf32>
    %61 = arith.addf %56, %60 : vector<1x128xf32>
    %c12 = arith.constant 12 : index
    %62 = memref.load %arg1[%c12] : memref<16xf32, #tpu.memory_space<smem>>
    %c12_25 = arith.constant 12 : index
    %c0_26 = arith.constant 0 : index
    %63 = vector.load %arg3[%c12_25, %c0_26] : memref<16x128xf32, #tpu.memory_space<vmem>>, vector<1x128xf32>
    %64 = vector.broadcast %62 : f32 to vector<1x128xf32>
    %65 = arith.mulf %64, %63 : vector<1x128xf32>
    %66 = arith.addf %61, %65 : vector<1x128xf32>
    %c13 = arith.constant 13 : index
    %67 = memref.load %arg1[%c13] : memref<16xf32, #tpu.memory_space<smem>>
    %c13_27 = arith.constant 13 : index
    %c0_28 = arith.constant 0 : index
    %68 = vector.load %arg3[%c13_27, %c0_28] : memref<16x128xf32, #tpu.memory_space<vmem>>, vector<1x128xf32>
    %69 = vector.broadcast %67 : f32 to vector<1x128xf32>
    %70 = arith.mulf %69, %68 : vector<1x128xf32>
    %71 = arith.addf %66, %70 : vector<1x128xf32>
    %c14 = arith.constant 14 : index
    %72 = memref.load %arg1[%c14] : memref<16xf32, #tpu.memory_space<smem>>
    %c14_29 = arith.constant 14 : index
    %c0_30 = arith.constant 0 : index
    %73 = vector.load %arg3[%c14_29, %c0_30] : memref<16x128xf32, #tpu.memory_space<vmem>>, vector<1x128xf32>
    %74 = vector.broadcast %72 : f32 to vector<1x128xf32>
    %75 = arith.mulf %74, %73 : vector<1x128xf32>
    %76 = arith.addf %71, %75 : vector<1x128xf32>
    %c15 = arith.constant 15 : index
    %77 = memref.load %arg1[%c15] : memref<16xf32, #tpu.memory_space<smem>>
    %c15_31 = arith.constant 15 : index
    %c0_32 = arith.constant 0 : index
    %78 = vector.load %arg3[%c15_31, %c0_32] : memref<16x128xf32, #tpu.memory_space<vmem>>, vector<1x128xf32>
    %79 = vector.broadcast %77 : f32 to vector<1x128xf32>
    %80 = arith.mulf %79, %78 : vector<1x128xf32>
    %81 = arith.addf %76, %80 : vector<1x128xf32>
    %cst = arith.constant 0.000000e+00 : f32
    %82 = vector.broadcast %cst : f32 to vector<1x128xf32>
    %83 = arith.maximumf %81, %82 : vector<1x128xf32>
    %cst_33 = arith.constant 1.000000e+00 : f32
    %84 = vector.broadcast %cst_33 : f32 to vector<1x128xf32>
    %85 = arith.minimumf %83, %84 : vector<1x128xf32>
    %c0_34 = arith.constant 0 : index
    %c0_35 = arith.constant 0 : index
    %86 = vector.load %arg4[%c0_34, %c0_35] : memref<1x128xf32, #tpu.memory_space<vmem>>, vector<1x128xf32>
    tpu.vector_store %arg4[%c0_34, %c0_35], %85 {strides = array<i32>} : memref<1x128xf32, #tpu.memory_space<vmem>>, vector<1x128xf32>,
    return
  }
  func.func @transform_0(%arg0: i32) -> i32 {
    %c0_i32 = arith.constant 0 : i32
    %c0_i32_0 = arith.constant 0 : i32
    return %c0_i32 : i32
  }
  func.func @transform_1(%arg0: i32) -> i32 {
    %c0_i32 = arith.constant 0 : i32
    %c0_i32_0 = arith.constant 0 : i32
    return %c0_i32 : i32
  }
  func.func @transform_2(%arg0: i32) -> (i32, i32) {
    %c0_i32 = arith.constant 0 : i32
    %c0_i32_0 = arith.constant 0 : i32
    return %c0_i32, %arg0 : i32, i32
  }
  func.func @transform_3(%arg0: i32) -> (i32, i32) {
    %c0_i32 = arith.constant 0 : i32
    %c0_i32_0 = arith.constant 0 : i32
    return %c0_i32, %arg0 : i32, i32
  }
}

</mosaic_0001>

<bundles_post_ra>
// kernel: tpu_custom_call.1
= control target key start
LH: loop header
LB: loop body
LE: loop exit
PB: predicated region body
PF: predicated region fallthrough
CT: control target
= control target key end

     0   :  { %9 = vsyncpa [#allocation6], 0  ;;  %s281_s0 = inlined_call_operand.vmem [shape: f32[16], index: 0, kind: input, shape index: {}]   ;;  %s282_s1 = inlined_call_operand.<no memory space> [shape: f32[1], index: 1, kind: input, shape index: {}]   ;;  %s283_s2 = inlined_call_operand.hbm [shape: f32[16,128], index: 2, kind: input, shape index: {}]   ;;  %s284_s3 = inlined_call_operand.hbm [shape: f32[1,128], index: 3, kind: output, shape index: {}]  }
   0x1   :  { %10 = vsyncpa [#allocation4], 0 }
   0x2   :  { %11 = vsyncpa [#allocation5], 0  ;;  %s18_s14 = sshll.u32 %s281_s0, 4  ;;  %s19_s14 = int_to_ptr.vmem [resolvable:$true] %s18_s14 }
   0x3   :  { %s164_s15 = scalar_lea.vmem %s19_s14, 16  ;;  %p169_p1 = scmp.lt.s32.totalorder %s19_s14, %s19_s14 }
   0x4   :  { %p165_p0 = scmp.ne.s32.totalorder %s19_s14, %s164_s15  ;;  %p170_p2 = scmp.lt.s32.totalorder %s164_s15, %s164_s15 }
   0x6   :  { %p171_p3 = por %p170_p2, %p169_p1 }
   0x8   :  { %p172_p4 = pnand %p171_p3, %p165_p0 }
   0xa   :  { %175 = shalt.err (!%p172_p4)
}
   0xb   :  { %s226_s16 = smov [#allocation3]   ;;  %s227_s17 = smov [#allocation7]  }
   0xc   :  { %21 = dma.vmem_to_smem %s19_s14, 16, %s226_s16, [#allocation6]  }
   0xd   :  { %s29_s18 = sshll.u32 %s227_s17, 4  ;;  %s176_s21 = scalar_lea.hbm %s283_s2, 256  ;;  %s30_s18 = int_to_ptr.vmem [resolvable:$true] %s29_s18 }
   0xe   :  { %p177_p5 = scmp.ne.s32.totalorder %s283_s2, %s176_s21  ;;  %p180_p6 = scmp.lt.u32.totalorder %s176_s21, %s283_s2 }
  0x10   :  { %p182_p7 = pnand %p180_p6, %p177_p5 }
  0x12   :  { %185 = shalt.err (!%p182_p7)
}
  0x13   :  { %s186_s25 = scalar_lea.vmem %s30_s18, 256  ;;  %p191_p9 = scmp.lt.s32.totalorder %s30_s18, %s30_s18 }
  0x14   :  { %p187_p8 = scmp.ne.s32.totalorder %s30_s18, %s186_s25  ;;  %p192_p10 = scmp.lt.s32.totalorder %s186_s25, %s186_s25 }
  0x16   :  { %p193_p11 = por %p192_p10, %p191_p9 }
  0x18   :  { %p194_p12 = pnand %p193_p11, %p187_p8 }
  0x1a   :  { %197 = shalt.err (!%p194_p12)
}
  0x1b   :  { %s228_s26 = smov 128   ;;  %s229_s27 = smov 8  }
  0x1c   :  { %35 = dma.hbm_to_vmem [thread:$0]  %s283_s2, 256, %s30_s18, [#allocation4], %s228_s26, %s228_s26, %s229_s27  }
  0x1d   :  { %220 = dma.done.wait [#allocation6], 16  }
  0x1e   :  { %221 = vsyncadd [#allocation6], 4294967280 }
  0x1f   :  { %222 = dma.done.wait [#allocation4], 256  }
  0x20   :  { %223 = vsyncadd [#allocation4], 4294967040 }
  0x21   :  { %42 = sfence }
  0x22   :  { %s45_s30 = sld [smem:[#allocation3]]  ;;  %s144_s4 = sld [smem:[#allocation3 + $0x1]]  ;;  %v46_v0 = vld [vmem:[#allocation7] sm:$0x1]  ;;  %v51_v1 = vld [vmem:[#allocation7 + $0x1] sm:$0x1]  ;;  %v44_v2 = vstv %s282_s1 }
  0x23   :  { %s145_s5 = sld [smem:[#allocation3 + $0x2]]  ;;  %s146_s6 = sld [smem:[#allocation3 + $0x3]]  ;;  %v56_v5 = vld [vmem:[#allocation7 + $0x2] sm:$0x1]  ;;  %v61_v9 = vld [vmem:[#allocation7 + $0x3] sm:$0x1] }
  0x24   :  { %s147_s7 = sld [smem:[#allocation3 + $0x4]]  ;;  %s148_s8 = sld [smem:[#allocation3 + $0x5]]  ;;  %v66_v13 = vld [vmem:[#allocation7 + $0x4] sm:$0x1]  ;;  %v71_v17 = vld [vmem:[#allocation7 + $0x5] sm:$0x1] }
  0x25   :  { %s149_s2 = sld [smem:[#allocation3 + $0x6]]  ;;  %s150_s11 = sld [smem:[#allocation3 + $0x7]]  ;;  %v76_v21 = vld [vmem:[#allocation7 + $0x6] sm:$0x1]  ;;  %v81_v25 = vld [vmem:[#allocation7 + $0x7] sm:$0x1] }
  0x26   :  { %s151_s12 = sld [smem:[#allocation3 + $0x8]]  ;;  %s152_s1 = sld [smem:[#allocation3 + $0x9]]  ;;  %v86_v29 = vld [vmem:[#allocation7 + $0x8] sm:$0x1]  ;;  %v91_v33 = vld [vmem:[#allocation7 + $0x9] sm:$0x1] }
  0x27   :  { %s153_s13 = sld [smem:[#allocation3 + $0xa]]  ;;  %s154_s14 = sld [smem:[#allocation3 + $0xb]]  ;;  %v96_v37 = vld [vmem:[#allocation7 + $0xa] sm:$0x1]  ;;  %v101_v41 = vld [vmem:[#allocation7 + $0xb] sm:$0x1] }
  0x28   :  { %v47_v3 = vstv %s45_s30  ;;  %v52_v4 = vstv %s144_s4  ;;  %s155_s15 = sld [smem:[#allocation3 + $0xc]]  ;;  %s156_s16 = sld [smem:[#allocation3 + $0xd]]  ;;  %v106_v45 = vld [vmem:[#allocation7 + $0xc] sm:$0x1]  ;;  %v111_v49 = vld [vmem:[#allocation7 + $0xd] sm:$0x1] }
  0x29   :  { %v48_v6 = vmul.f32 %v47_v3, %v46_v0  ;;  %v53_v7 = vmul.f32 %v52_v4, %v51_v1  ;;  %v57_v8 = vstv %s145_s5  ;;  %v62_v10 = vstv %s146_s6  ;;  %s157_s17 = sld [smem:[#allocation3 + $0xe]]  ;;  %s158_s18 = sld [smem:[#allocation3 + $0xf]]  ;;  %v116_v53 = vld [vmem:[#allocation7 + $0xe] sm:$0x1]  ;;  %v121_v57 = vld [vmem:[#allocation7 + $0xf] sm:$0x1] }
  0x2a   :  { %v58_v12 = vmul.f32 %v57_v8, %v56_v5  ;;  %v67_v14 = vstv %s147_s7  ;;  %v63_v16 = vmul.f32 %v62_v10, %v61_v9  ;;  %v72_v18 = vstv %s148_s8  ;;  %s230_s19 = smov [#allocation8]  }
  0x2b   :  { %v49_v11 = vadd.f32 %v48_v6, %v44_v2  ;;  %v68_v20 = vmul.f32 %v67_v14, %v66_v13  ;;  %v77_v22 = vstv %s149_s2  ;;  %v73_v24 = vmul.f32 %v72_v18, %v71_v17  ;;  %s134_s20 = sshll.u32 %s230_s19, 4  ;;  %s135_s20 = int_to_ptr.vmem [resolvable:$true] %s134_s20 }
  0x2c   :  { %v82_v26 = vstv %s150_s11  ;;  %v78_v28 = vmul.f32 %v77_v22, %v76_v21  ;;  %v87_v30 = vstv %s151_s12  ;;  %v92_v34 = vstv %s152_s1  ;;  %s198_s21 = scalar_lea.vmem %s135_s20, 16  ;;  %s202_s22 = scalar_lea.vmem %s135_s20, 32 }
  0x2d   :  { %v54_v15 = vadd.f32 %v53_v7, %v49_v11  ;;  %v83_v32 = vmul.f32 %v82_v26, %v81_v25  ;;  %v88_v36 = vmul.f32 %v87_v30, %v86_v29  ;;  %v97_v38 = vstv %s153_s13  ;;  %p199_p13 = scmp.ne.s32.totalorder %s135_s20, %s198_s21  ;;  %p203_p0 = scmp.lt.s32.totalorder %s135_s20, %s135_s20 }
  0x2e   :  { %v93_v40 = vmul.f32 %v92_v34, %v91_v33  ;;  %v102_v42 = vstv %s154_s14  ;;  %v98_v44 = vmul.f32 %v97_v38, %v96_v37  ;;  %v107_v46 = vstv %s155_s15  ;;  %p204_p1 = scmp.lt.s32.totalorder %s202_s22, %s198_s21 }
  0x2f   :  { %v59_v19 = vadd.f32 %v58_v12, %v54_v15  ;;  %v103_v48 = vmul.f32 %v102_v42, %v101_v41  ;;  %v112_v50 = vstv %s156_s16  ;;  %v108_v52 = vmul.f32 %v107_v46, %v106_v45 }
  0x30   :  { %v117_v54 = vstv %s157_s17  ;;  %v113_v56 = vmul.f32 %v112_v50, %v111_v49  ;;  %v122_v58 = vstv %s158_s18  ;;  %p205_p2 = por %p204_p1, %p203_p0 }
  0x31   :  { %v64_v23 = vadd.f32 %v63_v16, %v59_v19  ;;  %v118_v60 = vmul.f32 %v117_v54, %v116_v53  ;;  %v123_v62 = vmul.f32 %v122_v58, %v121_v57 }
  0x32   :  { %p206_p3 = pnand %p205_p2, %p199_p13 }
  0x33   :  { %v69_v27 = vadd.f32 %v68_v20, %v64_v23 }
  0x35   :  { %v74_v31 = vadd.f32 %v73_v24, %v69_v27 }
  0x37   :  { %v79_v35 = vadd.f32 %v78_v28, %v74_v31 }
  0x39   :  { %v84_v39 = vadd.f32 %v83_v32, %v79_v35 }
  0x3b   :  { %v89_v43 = vadd.f32 %v88_v36, %v84_v39 }
  0x3d   :  { %v94_v47 = vadd.f32 %v93_v40, %v89_v43 }
  0x3f   :  { %v99_v51 = vadd.f32 %v98_v44, %v94_v47 }
  0x41   :  { %v104_v55 = vadd.f32 %v103_v48, %v99_v51 }
  0x43   :  { %v109_v59 = vadd.f32 %v108_v52, %v104_v55 }
  0x45   :  { %v114_v61 = vadd.f32 %v113_v56, %v109_v59 }
  0x47   :  { %v119_v63 = vadd.f32 %v118_v60, %v114_v61 }
  0x49   :  { %v124_v0 = vadd.f32 %v123_v62, %v119_v63 }
  0x4b   :  { %v125_v1 = vmax.f32 %v124_v0, 0.0 }
  0x4d   :  { %v126_v2 = vmin.f32 %v125_v1, 1.0 }
  0x4f   :  { %127 = vst [vmem:[#allocation8] sm:$0x1] %v126_v2 }
  0x50   :  { %209 = shalt.err (!%p206_p3)
}
  0x51   :  { %s210_s24 = scalar_lea.hbm %s284_s3, 16 }
  0x52   :  { %p211_p4 = scmp.ne.s32.totalorder %s284_s3, %s210_s24  ;;  %p214_p5 = scmp.lt.u32.totalorder %s210_s24, %s284_s3 }
  0x54   :  { %p216_p6 = pnand %p214_p5, %p211_p4 }
  0x56   :  { %219 = shalt.err (!%p216_p6)
}
  0x57   :  { %137 = dma.vmem_to_hbm [thread:$0]  %s135_s20, 16, %s284_s3, [#allocation5]  }
  0x58   :  { %224 = dma.done.wait [#allocation5], 16  }
  0x59   :  { %225 = vsyncadd [#allocation5], 4294967280 }
  0x5a   :  { %141 = vsyncpa [#allocation4], 1 }
  0x5b   :  { %142 = vsyncpa [#allocation5], 1 }
  0x5c   :  { %143 = vsyncpa [#allocation6], 1 }

</bundles_post_ra>
